<compile_context>
chip_gen: v5e
topology: v5e:2x2
jax: 0.10.0
libtpu: 0.0.40
codegen_flags: <defaults>
</compile_context>

<pallas_src>
import functools

import jax
import jax.numpy as jnp
from jax.experimental import pallas as pl
from jax.experimental.pallas import tpu as pltpu


def _sa_kernel(x_ref, w_qkv_ref, b_qkv_ref, wo_ref, bo_ref, o_ref, *,
               num_head, hidden_dim, use_bf16):
    """Whole SA forward for one image in a single grid-less kernel invocation.

    x_ref:     [S, D]        input image (VMEM resident)
    w_qkv_ref: [D, 3*H*D]    fused QKV weights; column blocks [Q_all | K_all | V_all],
                             each block head-major, Q block pre-scaled by 1/D**2
    b_qkv_ref: [1, 3*H*D]    fused QKV bias (Q part pre-scaled)
    wo_ref:    [H, D, D]     output projection per head (Wo.T reshaped)
    bo_ref:    [1, D]        output projection bias
    o_ref:     [S, D]        output
    """
    H, D = num_head, hidden_dim
    HD = H * D
    mm_dtype = jnp.bfloat16 if use_bf16 else jnp.float32

    x = x_ref[...]                                                   # [S, D]

    # (1) ONE fused QKV projection across all heads: [S,D] x [D, 3*H*D].
    qkv = jnp.dot(x.astype(mm_dtype), w_qkv_ref[...].astype(mm_dtype),
                  preferred_element_type=jnp.float32) + b_qkv_ref[...]   # [S, 3*H*D]

    # (2) Split into head-batched q/k/v: [H, S, D].  Blocks are sliced at H*D
    # boundaries; the per-head split is the unavoidable head-batching relayout.
    def split_heads(block):                                          # [S, H*D] -> [H, S, D]
        return jnp.stack([block[:, h * D:(h + 1) * D] for h in range(H)], axis=0)

    q = split_heads(qkv[:, 0 * HD:1 * HD])        # already scaled by 1/D**2
    k = split_heads(qkv[:, 1 * HD:2 * HD])
    v = split_heads(qkv[:, 2 * HD:3 * HD])

    # (3) Head-batched attention scores + numerically stable softmax(dim=-1).
    s = jnp.einsum('hqd,hkd->hqk', q.astype(mm_dtype), k.astype(mm_dtype),
                   preferred_element_type=jnp.float32)               # [H, S, S]
    s = s - jnp.max(s, axis=-1, keepdims=True)
    e = jnp.exp(s)
    inv_denom = pl.reciprocal(jnp.sum(e, axis=-1, keepdims=True), approx=True)
    p = e * inv_denom                                                # [H, S, S]

    heads = jnp.einsum('hqk,hkd->hqd', p.astype(mm_dtype), v.astype(mm_dtype),
                       preferred_element_type=jnp.float32)           # [H, S, D]

    # (4) Output projection: per-head partials accumulated over the head axis
    # (replaces the 32-lane-wide concat + [S,H*D]x[H*D,D] matmul).
    partials = jnp.einsum('hqd,hde->hqe', heads.astype(mm_dtype),
                          wo_ref[...].astype(mm_dtype),
                          preferred_element_type=jnp.float32)        # [H, S, D]
    o_ref[...] = jnp.sum(partials, axis=0) + bo_ref[...]             # [S, D]


def sa_forward(x, params, *, use_bf16=False):
    """x: [B, S, D] float32. Returns [1, S, D] (only x[0] is processed,
    faithful to the PyTorch early return)."""
    w_qkv, b_qkv, wo_heads, bo = params
    H, _, D = wo_heads.shape
    S = x.shape[1]
    img = x[0]

    kernel = functools.partial(_sa_kernel, num_head=H, hidden_dim=D,
                               use_bf16=use_bf16)
    vmem = pltpu.MemorySpace.VMEM

    out = pl.pallas_call(
        kernel,
        out_shape=jax.ShapeDtypeStruct((S, D), jnp.float32),
        in_specs=[pl.BlockSpec(memory_space=vmem)] * 5,   # whole arrays, VMEM resident
        out_specs=pl.BlockSpec(memory_space=vmem),
    )(img, w_qkv, b_qkv, wo_heads, bo)

    return out[None]  # [1, S, D]


def init_params(key, hidden_dim, num_head):
    """Deterministic nn.Linear-style init.

    Returns (kernel_params, raw):
      kernel_params = (W_all  [D, 3*H*D]  columns = [Q_all | K_all | V_all],
                              head-major inside each block, Q pre-scaled by 1/D**2,
                       b_all  [1, 3*H*D]  (Q part pre-scaled),
                       Wo_h   [H, D, D]   (Wo.T reshaped per head),
                       bo     [1, D])
      raw           = PyTorch-layout copies for the reference implementation.
    """
    D, H = hidden_dim, num_head

    def linear(k, out_dim, in_dim):
        bound = 1.0 / (in_dim ** 0.5)
        kw, kb = jax.random.split(k)
        W = jax.random.uniform(kw, (out_dim, in_dim), jnp.float32, -bound, bound)
        b = jax.random.uniform(kb, (out_dim,), jnp.float32, -bound, bound)
        return W, b

    keys = jax.random.split(key, 3 * H + 1)
    Wq = jnp.stack([linear(keys[3 * h + 0], D, D)[0] for h in range(H)])  # [H, D, D] (out,in)
    bq = jnp.stack([linear(keys[3 * h + 0], D, D)[1] for h in range(H)])  # [H, D]
    Wk = jnp.stack([linear(keys[3 * h + 1], D, D)[0] for h in range(H)])
    bk = jnp.stack([linear(keys[3 * h + 1], D, D)[1] for h in range(H)])
    Wv = jnp.stack([linear(keys[3 * h + 2], D, D)[0] for h in range(H)])
    bv = jnp.stack([linear(keys[3 * h + 2], D, D)[1] for h in range(H)])
    Wo, bo = linear(keys[-1], D, H * D)                                    # [D, H*D], [D]

    raw = (Wq, bq, Wk, bk, Wv, bv, Wo, bo)

    # Kernel layout: transpose each head's weight to [D_in, D_out], fold 1/D**2
    # into the Q projection (weights + bias), fuse Q/K/V across heads along the
    # output dim into one [D, 3*H*D] matrix, and reshape Wo.T per head.
    scale = 1.0 / (float(D) ** 2)
    q_block = jnp.concatenate([Wq[h].T * scale for h in range(H)], axis=1)  # [D, H*D]
    k_block = jnp.concatenate([Wk[h].T for h in range(H)], axis=1)          # [D, H*D]
    v_block = jnp.concatenate([Wv[h].T for h in range(H)], axis=1)          # [D, H*D]
    w_all = jnp.concatenate([q_block, k_block, v_block], axis=1)            # [D, 3*H*D]
    b_all = jnp.concatenate([bq.reshape(-1) * scale,
                             bk.reshape(-1),
                             bv.reshape(-1)])[None, :]                      # [1, 3*H*D]

    wo_heads = Wo.T.reshape(H, D, D)   # [H, D_in, D_out]; matches torch.hstack head order

    kernel_params = (w_all, b_all, wo_heads, bo[None, :])
    return kernel_params, raw


def reference_forward(x, raw, num_head):
    """Pure-JAX re-implementation of the PyTorch forward (only x[0], 1/D**2 scaling)."""
    Wq, bq, Wk, bk, Wv, bv, Wo, bo = raw
    img = x[0]
    S, D = img.shape
    heads = []
    for h in range(num_head):
        q = img @ Wq[h].T + bq[h]
        k = img @ Wk[h].T + bk[h]
        v = img @ Wv[h].T + bv[h]
        s = (q @ k.T) / (D ** 2)
        p = jax.nn.softmax(s, axis=-1)
        heads.append(p @ v)
    H_stacked = jnp.concatenate(heads, axis=-1)        # [S, H*D]
    out = H_stacked @ Wo.T + bo                        # [S, D]
    return out[None]                                   # [1, S, D]


if __name__ == "__main__":
    B, S, D, H = 2, 8, 32, 2
    key = jax.random.PRNGKey(0)
    kx, kp = jax.random.split(key)
    x = jax.random.normal(kx, (B, S, D), dtype=jnp.float32)

    kernel_params, raw = init_params(kp, D, H)

    out = sa_forward(x, kernel_params)
    out = jax.block_until_ready(out)

    ref = reference_forward(x, raw, H)
    assert out.shape == (1, S, D), out.shape
    # Tolerance accounts for the EUP approximate reciprocal in the softmax and
    # the reordered (fused / head-batched) f32 accumulations.
    assert jnp.allclose(out, ref, rtol=1e-3, atol=1e-3), float(jnp.max(jnp.abs(out - ref)))

    print("KERNEL_OK")
</pallas_src>

<mosaic_0001>
module attributes {stable_mosaic.version = 11 : i64} {
  func.func @_sa_kernel(%arg0: memref<8x32xf32, #tpu.memory_space<vmem>>, %arg1: memref<32x192xf32, #tpu.memory_space<vmem>>, %arg2: memref<1x192xf32, #tpu.memory_space<vmem>>, %arg3: memref<2x32x32xf32, #tpu.memory_space<vmem>>, %arg4: memref<1x32xf32, #tpu.memory_space<vmem>>, %arg5: memref<8x32xf32, #tpu.memory_space<vmem>>) attributes {dimension_semantics = [], scalar_prefetch = 0 : i64, scratch_operands = 0 : i64, tpu.core_type = #tpu.core_type<tc>} {
    %c0 = arith.constant 0 : index
    %c0_0 = arith.constant 0 : index
    %0 = vector.load %arg0[%c0, %c0_0] : memref<8x32xf32, #tpu.memory_space<vmem>>, vector<8x32xf32>
    %c0_1 = arith.constant 0 : index
    %c0_2 = arith.constant 0 : index
    %1 = vector.load %arg1[%c0_1, %c0_2] : memref<32x192xf32, #tpu.memory_space<vmem>>, vector<32x192xf32>
    %cst = arith.constant dense<0.000000e+00> : vector<8x192xf32>
    %2 = tpu.matmul %0, %1, %cst {dimension_numbers = #tpu.dot_dimension_numbers<[1], [0], [0], [1], [0, 0, 1, 1], [], []>} : vector<8x32xf32>, vector<32x192xf32>, vector<8x192xf32> -> vector<8x192xf32>
    %c0_3 = arith.constant 0 : index
    %c0_4 = arith.constant 0 : index
    %3 = vector.load %arg2[%c0_3, %c0_4] : memref<1x192xf32, #tpu.memory_space<vmem>>, vector<1x192xf32>
    %4 = vector.broadcast %3 : vector<1x192xf32> to vector<8x192xf32>
    %5 = arith.addf %2, %4 : vector<8x192xf32>
    %6 = vector.extract_strided_slice %5 {offsets = [0, 0], sizes = [8, 64], strides = [1, 1]} : vector<8x192xf32> to vector<8x64xf32>
    %7 = vector.extract_strided_slice %6 {offsets = [0, 0], sizes = [8, 32], strides = [1, 1]} : vector<8x64xf32> to vector<8x32xf32>
    %8 = vector.extract_strided_slice %6 {offsets = [0, 32], sizes = [8, 32], strides = [1, 1]} : vector<8x64xf32> to vector<8x32xf32>
    %9 = vector.shape_cast %7 : vector<8x32xf32> to vector<1x8x32xf32>
    %10 = vector.shape_cast %8 : vector<8x32xf32> to vector<1x8x32xf32>
    %11 = tpu.concatenate %9, %10 in 0 : vector<1x8x32xf32>, vector<1x8x32xf32> -> vector<2x8x32xf32>
    %12 = vector.extract_strided_slice %5 {offsets = [0, 64], sizes = [8, 64], strides = [1, 1]} : vector<8x192xf32> to vector<8x64xf32>
    %13 = vector.extract_strided_slice %12 {offsets = [0, 0], sizes = [8, 32], strides = [1, 1]} : vector<8x64xf32> to vector<8x32xf32>
    %14 = vector.extract_strided_slice %12 {offsets = [0, 32], sizes = [8, 32], strides = [1, 1]} : vector<8x64xf32> to vector<8x32xf32>
    %15 = vector.shape_cast %13 : vector<8x32xf32> to vector<1x8x32xf32>
    %16 = vector.shape_cast %14 : vector<8x32xf32> to vector<1x8x32xf32>
    %17 = tpu.concatenate %15, %16 in 0 : vector<1x8x32xf32>, vector<1x8x32xf32> -> vector<2x8x32xf32>
    %18 = vector.extract_strided_slice %5 {offsets = [0, 128], sizes = [8, 64], strides = [1, 1]} : vector<8x192xf32> to vector<8x64xf32>
    %19 = vector.extract_strided_slice %18 {offsets = [0, 0], sizes = [8, 32], strides = [1, 1]} : vector<8x64xf32> to vector<8x32xf32>
    %20 = vector.extract_strided_slice %18 {offsets = [0, 32], sizes = [8, 32], strides = [1, 1]} : vector<8x64xf32> to vector<8x32xf32>
    %21 = vector.shape_cast %19 : vector<8x32xf32> to vector<1x8x32xf32>
    %22 = vector.shape_cast %20 : vector<8x32xf32> to vector<1x8x32xf32>
    %23 = tpu.concatenate %21, %22 in 0 : vector<1x8x32xf32>, vector<1x8x32xf32> -> vector<2x8x32xf32>
    "tpu.trace_start"() <{level = 10 : i32, message = "hqd,hkd->hqk"}> : () -> ()
    %cst_5 = arith.constant dense<0.000000e+00> : vector<2x8x8xf32>
    %24 = tpu.matmul %11, %17, %cst_5 {dimension_numbers = #tpu.dot_dimension_numbers<[2], [2], [1], [1], [0, 0, 0, 1, 1, 1], [0], [0]>} : vector<2x8x32xf32>, vector<2x8x32xf32>, vector<2x8x8xf32> -> vector<2x8x8xf32>
    "tpu.trace_stop"() : () -> ()
    %cst_6 = arith.constant dense<0xFF800000> : vector<2x8xf32>
    %25 = vector.multi_reduction <maximumf>, %24, %cst_6 [2] : vector<2x8x8xf32> to vector<2x8xf32>
    %26 = vector.shape_cast %25 : vector<2x8xf32> to vector<2x8x1xf32>
    %27 = vector.broadcast %26 : vector<2x8x1xf32> to vector<2x8x8xf32>
    %28 = arith.subf %24, %27 : vector<2x8x8xf32>
    %29 = math.exp %28 : vector<2x8x8xf32>
    %cst_7 = arith.constant dense<0.000000e+00> : vector<2x8xf32>
    %30 = vector.multi_reduction <add>, %29, %cst_7 [2] : vector<2x8x8xf32> to vector<2x8xf32>
    %31 = vector.shape_cast %30 : vector<2x8xf32> to vector<2x8x1xf32>
    %32 = tpu.reciprocal %31 {approx = true} : vector<2x8x1xf32> -> vector<2x8x1xf32>
    %33 = vector.broadcast %32 : vector<2x8x1xf32> to vector<2x8x8xf32>
    %34 = arith.mulf %29, %33 : vector<2x8x8xf32>
    "tpu.trace_start"() <{level = 10 : i32, message = "hqk,hkd->hqd"}> : () -> ()
    %cst_8 = arith.constant dense<0.000000e+00> : vector<2x8x32xf32>
    %35 = tpu.matmul %34, %23, %cst_8 {dimension_numbers = #tpu.dot_dimension_numbers<[2], [1], [1], [2], [0, 0, 0, 1, 1, 2], [0], [0]>} : vector<2x8x8xf32>, vector<2x8x32xf32>, vector<2x8x32xf32> -> vector<2x8x32xf32>
    "tpu.trace_stop"() : () -> ()
    %c0_9 = arith.constant 0 : index
    %c0_10 = arith.constant 0 : index
    %c0_11 = arith.constant 0 : index
    %36 = vector.load %arg3[%c0_9, %c0_10, %c0_11] : memref<2x32x32xf32, #tpu.memory_space<vmem>>, vector<2x32x32xf32>
    "tpu.trace_start"() <{level = 10 : i32, message = "hqd,hde->hqe"}> : () -> ()
    %cst_12 = arith.constant dense<0.000000e+00> : vector<2x8x32xf32>
    %37 = tpu.matmul %35, %36, %cst_12 {dimension_numbers = #tpu.dot_dimension_numbers<[2], [1], [1], [2], [0, 0, 0, 1, 1, 2], [0], [0]>} : vector<2x8x32xf32>, vector<2x32x32xf32>, vector<2x8x32xf32> -> vector<2x8x32xf32>
    "tpu.trace_stop"() : () -> ()
    %cst_13 = arith.constant dense<0.000000e+00> : vector<8x32xf32>
    %38 = vector.multi_reduction <add>, %37, %cst_13 [0] : vector<2x8x32xf32> to vector<8x32xf32>
    %c0_14 = arith.constant 0 : index
    %c0_15 = arith.constant 0 : index
    %39 = vector.load %arg4[%c0_14, %c0_15] : memref<1x32xf32, #tpu.memory_space<vmem>>, vector<1x32xf32>
    %40 = vector.broadcast %39 : vector<1x32xf32> to vector<8x32xf32>
    %41 = arith.addf %38, %40 : vector<8x32xf32>
    %c0_16 = arith.constant 0 : index
    %c0_17 = arith.constant 0 : index
    %42 = vector.load %arg5[%c0_16, %c0_17] : memref<8x32xf32, #tpu.memory_space<vmem>>, vector<8x32xf32>
    tpu.vector_store %arg5[%c0_16, %c0_17], %41 {strides = array<i32>} : memref<8x32xf32, #tpu.memory_space<vmem>>, vector<8x32xf32>,
    return
  }
}

</mosaic_0001>

<bundles_post_ra>
// kernel: tpu_custom_call.1
= control target key start
LH: loop header
LB: loop body
LE: loop exit
PB: predicated region body
PF: predicated region fallthrough
CT: control target
= control target key end

     0   :  { %10 = vsyncpa [#allocation3], 0  ;;  %s585_s0 = inlined_call_operand.hbm [shape: f32[8,32], index: 0, kind: input, shape index: {}]   ;;  %s586_s1 = inlined_call_operand.hbm [shape: f32[32,192], index: 1, kind: input, shape index: {}]   ;;  %s587_s2 = inlined_call_operand.hbm [shape: f32[1,192], index: 2, kind: input, shape index: {}]   ;;  %s588_s3 = inlined_call_operand.hbm [shape: f32[2,32,32], index: 3, kind: input, shape index: {}]   ;;  %s589_s4 = inlined_call_operand.vmem [shape: f32[1,32], index: 4, kind: input, shape index: {}]   ;;  %s590_s5 = inlined_call_operand.hbm [shape: f32[8,32], index: 5, kind: output, shape index: {}]  }
   0x1   :  { %11 = vsyncpa [#allocation6], 0 }
   0x2   :  { %12 = vsyncpa [#allocation9], 0  ;;  %s29_s20 = sshll.u32 %s586_s1, 4  ;;  %s30_s20 = int_to_ptr.hbm [resolvable:$true] %s29_s20 }
   0x3   :  { %13 = vsyncpa [#allocation4], 0  ;;  %s507_s21 = smov [#allocation5]   ;;  %s19_s25 = sshll.u32 %s585_s0, 4  ;;  %s20_s25 = int_to_ptr.hbm [resolvable:$true] %s19_s25 }
   0x4   :  { %s31_s22 = sshll.u32 %s507_s21, 4  ;;  %s508_s26 = smov 256   ;;  %s32_s22 = int_to_ptr.vmem [resolvable:$true] %s31_s22 }
   0x5   :  { %s509_s27 = smov 16   ;;  %s510_s28 = smov [#allocation2]  }
   0x6   :  { %37 = dma.hbm_to_vmem [thread:$0]  %s30_s20, 1024, %s32_s22, [#allocation6], %s508_s26, %s508_s26, %s509_s27  }
   0x7   :  { %s21_s29 = sshll.u32 %s510_s28, 4  ;;  %s43_s7 = sshll.u32 %s587_s2, 4  ;;  %s22_s29 = int_to_ptr.vmem [resolvable:$true] %s21_s29  ;;  %s44_s7 = int_to_ptr.hbm [resolvable:$true] %s43_s7 }
   0x8   :  { %24 = dma.hbm_to_vmem [thread:$0]  %s20_s25, 128, %s22_s29, [#allocation3]  }
   0x9   :  { %s53_s9 = sshll.u32 %s588_s3, 4  ;;  %s511_s10 = smov [#allocation7]   ;;  %s54_s9 = int_to_ptr.hbm [resolvable:$true] %s53_s9 }
   0xa   :  { %s45_s11 = sshll.u32 %s511_s10, 4  ;;  %s512_s0 = smov [#allocation8]   ;;  %s46_s11 = int_to_ptr.vmem [resolvable:$true] %s45_s11 }
   0xb   :  { %48 = dma.hbm_to_vmem [thread:$0]  %s44_s7, 32, %s46_s11, [#allocation6]  }
   0xc   :  { %s55_s12 = sshll.u32 %s512_s0, 4  ;;  %s513_s13 = smov 128   ;;  %s56_s12 = int_to_ptr.vmem [resolvable:$true] %s55_s12 }
   0xd   :  { %s514_s14 = smov 8  }
   0xe   :  { %61 = dma.hbm_to_vmem [thread:$0]  %s54_s9, 1024, %s56_s12, [#allocation9], %s513_s13, %s513_s13, %s514_s14  }
   0xf   :  { %499 = dma.done.wait [#allocation3], 128  }
  0x10   :  { %500 = vsyncadd [#allocation3], 4294967168 }
  0x11   :  { %501 = dma.done.wait [#allocation6], 1056  }
  0x12   :  { %502 = vsyncadd [#allocation6], 4294966240 }
  0x13   :  { %503 = dma.done.wait [#allocation9], 1024  }
  0x14   :  { %504 = vsyncadd [#allocation9], 4294966272  ;;  %v87_v0 = vld [vmem:[#allocation5 + $0x30] sm:$0xff]  ;;  %v85_v1 = vld [vmem:[#allocation5 + $0x20] sm:$0xff]  ;;  %vm95_vm0 = vcmask 261120   ;;  %s515_s2 = smov 96  }
  0x15   :  { %111 = vmatpush.msra.mxu0 %v87_v0  ;;  %v83_v2 = vld [vmem:[#allocation5 + $0x10] sm:$0xff]  ;;  %v81_v3 = vld [vmem:[#allocation5] sm:$0xff]  ;;  %v80_v4 = vld [vmem:[#allocation2] sm:$0xff]  ;;  %s516_s3 = smov 64   ;;  %vm198_vm1 = vcmask 64512   ;;  %s517_s17 = smov [#allocation10]  }
  0x16   :  { %v89_v5 = vld [vmem:[#allocation7] sm:$0x3]  ;;  %v88_v14 = vld [vmem:[#allocation5 + $0x38] sm:$0xff]  ;;  %v86_v15 = vld [vmem:[#allocation5 + $0x28] sm:$0xff]  ;;  %s335_s18 = sshll.u32 %s517_s17, 4  ;;  %s337_s21 = sshll.u32 %s590_s5, 4  ;;  %s336_s18 = int_to_ptr.vmem [resolvable:$true] %s335_s18  ;;  %s338_s21 = int_to_ptr.hbm [resolvable:$true] %s337_s21 }
  0x17   :  { %112 = vmatpush.msra.mxu0 %v85_v1  ;;  %v91_v6 = vperm.slane %v89_v5, 0  ;;  %131 = vmatpush.msra.mxu1 %v88_v14  ;;  %v84_v16 = vld [vmem:[#allocation5 + $0x18] sm:$0xff]  ;;  %v82_v17 = vld [vmem:[#allocation5 + $0x8] sm:$0xff]  ;;  %v92_v25 = vperm.slane %v89_v5, 1 }
  0x18   :  { %v270_v37 = vld [vmem:[#allocation8 + $0x18] sm:$0xff]  ;;  %v269_v38 = vld [vmem:[#allocation8 + $0x10] sm:$0xff]  ;;  %v268_v39 = vld [vmem:[#allocation8 + $0x8] sm:$0xff] }
  0x19   :  { %113 = vmatpush.msra.mxu0 %v83_v2  ;;  %132 = vmatpush.msra.mxu1 %v86_v15  ;;  %v267_v41 = vld [vmem:[#allocation8] sm:$0xff]  ;;  %v274_v42 = vld [vmem:[#allocation8 + $0x38] sm:$0xff]  ;;  %v273_v43 = vld [vmem:[#allocation8 + $0x30] sm:$0xff] }
  0x1a   :  { %v272_v44 = vld [vmem:[#allocation8 + $0x28] sm:$0xff]  ;;  %v271_v46 = vld [vmem:[#allocation8 + $0x20] sm:$0xff]  ;;  %v370_v52 = vld [vmem:[%s589_s4] ss:$0 sm:$0xff] }
  0x1b   :  { %114 = vmatpush.msra.mxu0 %v81_v3  ;;  %133 = vmatpush.msra.mxu1 %v84_v16 }
  0x1c   :  { %349 = vmatmul.msk.f32.vlgmr.msra.gmra.mxu0 %vm95_vm0, %v80_v4 }
  0x1d   :  { %134 = vmatpush.msra.mxu1 %v82_v17  ;;  %290 = vmatpush.msrb.mxu0 %v270_v37 }
  0x1e   :  { %350 = vmatmul.msk.f32.vlgmr.msra.gmra.mxu1 %vm95_vm0, %v80_v4 }
  0x1f   :  { %291 = vmatpush.msrb.mxu0 %v269_v38  ;;  %313 = vmatpush.msrb.mxu1 %v274_v42 }
  0x21   :  { %292 = vmatpush.msrb.mxu0 %v268_v39  ;;  %314 = vmatpush.msrb.mxu1 %v273_v43 }
  0x23   :  { %293 = vmatpush.msrb.mxu0 %v267_v41  ;;  %315 = vmatpush.msrb.mxu1 %v272_v44 }
  0x25   :  { %316 = vmatpush.msrb.mxu1 %v271_v46 }
  0x99   :  { %v116_v7 = vpop.f32.mrf.mxu0 }
  0x9a   :  { %v117_v8 = vadd.f32 %v116_v7, %v91_v6 }
  0x9b   :  { %v136_v26 = vpop.f32.mrf.mxu1 }
  0x9c   :  { %140 = vrot.lane.b32.xlu0 %v117_v8, %s515_s2  ;;  %v137_v27 = vadd.f32 %v136_v26, %v92_v25 }
  0xa4   :  { %146 = vrot.lane.b32.xlu0 %v117_v8, %s516_s3 }
 0x10e   :  { %v141_v9 = vpop.permute.xlu0 %140 }
 0x10f   :  { %172 = vrot.lane.b32.xlu1 %v141_v9, %s516_s3 }
 0x116   :  { %v147_v10 = vpop.permute.xlu0 %146 }
 0x117   :  { %351 = vmatpush.xpose.msk.msra.mxu2 %vm95_vm0, %v147_v10 }
 0x11a   :  { %352 = vmatmul.msk.f32.vlgmr.msra.gmra.mxu2 %vm95_vm0, %v117_v8 }
 0x11b   :  { %239 = vmatpush.msrb.mxu2 %v137_v27 }
 0x181   :  { %v173_v11 = vpop.permute.xlu1 %172 }
 0x182   :  { %353 = vmatpush.xpose.msk.msra.mxu3 %vm95_vm0, %v173_v11 }
 0x185   :  { %354 = vmatmul.msk.f32.vlgmr.msra.gmra.mxu3 %vm95_vm0, %v141_v9 }
 0x19d   :  { %v169_v12 = vpop.f32.mrf.mxu2 }
 0x19e   :  { %v199_v13 = vsel %vm198_vm1, %v169_v12, -inf }
 0x19f   :  { %200 = vmax.xlane.f32.xlu1 %v199_v13 }
 0x208   :  { %v195_v18 = vpop.f32.mrf.mxu3 }
 0x209   :  { %v202_v19 = vsel %vm198_vm1, %v195_v18, -inf }
 0x20a   :  { %203 = vmax.xlane.f32.xlu2 %v202_v19 }
 0x212   :  { %v201_v20 = vpop.xlane.xlu1 %200 }
 0x213   :  { %v205_v21 = vsub.f32 %v169_v12, %v201_v20 }
 0x215   :  { %v207_v22 = vmul.f32 1.442695, %v205_v21 }
 0x217   :  { %371 = vpow2.f32 %v207_v22 }
 0x21d   :  { %v372_v23 = vpop.eup %371 }
 0x21e   :  { %v211_v24 = vsel %vm198_vm1, %v372_v23, 0.0 }
 0x21f   :  { %212 = vadd.xlane.f32.xlu2 %v211_v24 }
 0x237   :  { %143 = vrot.lane.b32.xlu2 %v137_v27, %s515_s2 }
 0x27d   :  { %v204_v28 = vpop.xlane.xlu2 %203 }
 0x27e   :  { %v206_v29 = vsub.f32 %v195_v18, %v204_v28 }
 0x280   :  { %v209_v30 = vmul.f32 1.442695, %v206_v29 }
 0x282   :  { %373 = vpow2.f32 %v209_v30 }
 0x288   :  { %v374_v31 = vpop.eup %373 }
 0x289   :  { %v214_v32 = vsel %vm198_vm1, %v374_v31, 0.0 }
 0x28a   :  { %215 = vadd.xlane.f32.xlu0 %v214_v32 }
 0x292   :  { %v213_v33 = vpop.xlane.xlu2 %212 }
 0x293   :  { %375 = vrcp.f32 %v213_v33 }
 0x299   :  { %v376_v34 = vpop.eup %375 }
 0x29a   :  { %v219_v35 = vmul.f32 %v376_v34, %v372_v23  ;;  %v144_v36 = vpop.permute.xlu2 %143 }
 0x29b   :  { %262 = vmatpush.msrb.mxu3 %v144_v36 }
 0x29c   :  { %355 = vmatmul.msk.f32.vlgmr.msrb.gmra.mxu2 %vm198_vm1, %v219_v35 }
 0x2fd   :  { %v216_v40 = vpop.xlane.xlu0 %215 }
 0x2fe   :  { %377 = vrcp.f32 %v216_v40 }
 0x304   :  { %v378_v45 = vpop.eup %377 }
 0x305   :  { %v220_v47 = vmul.f32 %v378_v45, %v374_v31 }
 0x307   :  { %356 = vmatmul.msk.f32.vlgmr.msrb.gmra.mxu3 %vm198_vm1, %v220_v47 }
 0x31f   :  { %v241_v48 = vpop.f32.mrf.mxu2 }
 0x320   :  { %357 = vmatmul.msk.f32.vlgmr.msrb.gmra.mxu0 %vm95_vm0, %v241_v48 }
 0x38a   :  { %v264_v49 = vpop.f32.mrf.mxu3 }
 0x38b   :  { %358 = vmatmul.msk.f32.vlgmr.msrb.gmra.mxu1 %vm95_vm0, %v264_v49 }
 0x39d   :  { %v295_v50 = vpop.f32.mrf.mxu0 }
 0x39e   :  { %v321_v53 = vsel %vm95_vm0, %v295_v50, 0.0 }
 0x408   :  { %v318_v51 = vpop.f32.mrf.mxu1 }
 0x409   :  { %v322_v54 = vsel %vm95_vm0, %v318_v51, 0.0 }
 0x40a   :  { %v323_v55 = vadd.f32 %v322_v54, %v321_v53 }
 0x40c   :  { %v328_v56 = vadd.f32 %v370_v52, %v323_v55 }
 0x40e   :  { %329 = vst.msk [vmem:[#allocation10] sm:$0xff] %vm95_vm0, %v328_v56 }
 0x40f   :  { %340 = dma.vmem_to_hbm [thread:$0]  %s336_s18, 128, %s338_s21, [#allocation4]  }
 0x410   :  { %505 = dma.done.wait [#allocation4], 128  }
 0x411   :  { %506 = vsyncadd [#allocation4], 4294967168 }
 0x412   :  { %345 = vsyncpa [#allocation3], 1 }
 0x413   :  { %346 = vsyncpa [#allocation6], 1 }
 0x414   :  { %347 = vsyncpa [#allocation9], 1 }
 0x415   :  { %348 = vsyncpa [#allocation4], 1 }

</bundles_post_ra>
